<compile_context>
chip_gen: v5e
topology: v5e:2x2
jax: 0.10.0
libtpu: 0.0.40
codegen_flags: <defaults>
</compile_context>

<pallas_src>
import jax
import jax.numpy as jnp
from jax.experimental import pallas as pl
from jax.experimental.pallas import tpu as pltpu

# ---- scaled-down synthetic config (analog of the 128->112 crop, 512-d embedding) ----
IMG = 32            # analog of the 128x128 input resolution
CROP = 2            # analog of cropping 8 px per side -> 112x112
CIN = 3
BATCH = 2
CONV_K = 3
CONV_STRIDE = 2
CONV_PAD = 1
CONV_OUT = 32
EMBED = 128         # analog of the 512-d ArcFace embedding

HC = IMG - 2 * CROP                                     # cropped spatial size (28)
HO = (HC + 2 * CONV_PAD - CONV_K) // CONV_STRIDE + 1    # conv output size (14)
P_REAL = HO * HO                                        # patches per image (196)
K_RAW = CONV_K * CONV_K * CIN                           # im2col depth (27)
K_PAD = 32                                              # zero-padded, MXU/lane friendly
P_PAD = 208                                             # multiple of 16: bf16 reshape-safe


def _im2col(x_nhwc, ksize, stride, pad):
    """Unfold NHWC image into (B, Ho*Wo, ksize*ksize*C) patch matrix (wrapper glue).

    Row ordering of the K axis is (kh, kw, c) with c innermost; the synthetic
    conv weights below use the same ordering (a real checkpoint stored as
    (C_out, C_in, kh, kw) would need an explicit permutation).
    """
    B, H, W, C = x_nhwc.shape
    xp = jnp.pad(x_nhwc, ((0, 0), (pad, pad), (pad, pad), (0, 0)))
    Ho = (H + 2 * pad - ksize) // stride + 1
    Wo = (W + 2 * pad - ksize) // stride + 1
    cols = []
    for kh in range(ksize):
        for kw in range(ksize):
            cols.append(xp[:, kh:kh + stride * Ho:stride,
                           kw:kw + stride * Wo:stride, :])
    p = jnp.stack(cols, axis=3)                      # (B, Ho, Wo, k*k, C)
    return p.reshape(B, Ho * Wo, ksize * ksize * C)  # (B, P, K)


def _feat_kernel(p_ref, conv_w_ref, fc_w_ref, fc_b_ref, feat_ref):
    """One grid step: all G images of one group, full pipeline, no scratch."""
    g, p_pad, k_pad = p_ref.shape

    # conv lowered to one flattened im2col matmul on the MXU (bf16 in, f32 acc).
    # P_PAD is a multiple of 16, so the bf16 (g, P_PAD, K) -> (g*P_PAD, K)
    # reshape does not cross a sublane-tile boundary (no relayout copy).
    patches = p_ref[...].reshape(g * p_pad, k_pad)                       # (g*P_PAD, K) bf16
    z = jnp.dot(patches, conv_w_ref[...],
                preferred_element_type=jnp.float32)                      # (g*P_PAD, CONV_OUT)
    z = jnp.maximum(z, 0.0)                                              # ReLU (f32, VPU)

    # Global average pool: sublane-axis sum (XLU); the 1/P_REAL mean scale is
    # folded into fc_w in the wrapper.  Zero-padded patch rows give z == 0
    # (no conv bias), so summing the padded rows is exact.
    pooled = jnp.sum(z.reshape(g, p_pad, CONV_OUT), axis=1)              # (g, CONV_OUT) f32

    f = jnp.dot(pooled.astype(jnp.bfloat16), fc_w_ref[...],
                preferred_element_type=jnp.float32) + fc_b_ref[...]      # (g, EMBED) f32
    inv = jax.lax.rsqrt(jnp.sum(f * f, axis=1, keepdims=True) + 1e-12)
    feat_ref[0] = f * inv                                                # L2-normalized slab


@jax.jit
def id_loss(y_hat, y, conv_w, fc_w, fc_b):
    b = y_hat.shape[0]

    # --- wrapper prep: concat first, crop, cast to bf16 BEFORE the 9-slice unfold ---
    x = jnp.concatenate([y_hat, y], axis=0)                   # (2b, C, H, W)
    x = x[:, :, CROP:IMG - CROP, CROP:IMG - CROP]              # center crop (8:120 analog)
    # TODO(synk): face_pool = AdaptiveAvgPool2d(112) is an identity after the crop here;
    # general adaptive pooling to an arbitrary target size is not implemented.
    x = jnp.transpose(x, (0, 2, 3, 1)).astype(jnp.bfloat16)    # NCHW -> NHWC, bf16
    # TODO(synk): the unfold could move fully in-kernel via stride-2 pl.ds loads on the
    # cropped image; kept in the wrapper (bf16, K padded only to 32) for robustness.
    patches = _im2col(x, CONV_K, CONV_STRIDE, CONV_PAD)         # (2b, 196, 27) bf16
    patches = jnp.pad(patches, ((0, 0), (0, P_PAD - P_REAL), (0, K_PAD - K_RAW)))

    conv_w_p = jnp.pad(conv_w, ((0, K_PAD - K_RAW), (0, 0))).astype(jnp.bfloat16)
    fc_w_s = (fc_w / P_REAL).astype(jnp.bfloat16)   # fold the global-avg-pool 1/P into FC
    fc_b_b = fc_b.astype(jnp.bfloat16)

    n_groups = 2       # group 0 = y_hat images, group 1 = y images
    g = b              # images per grid step

    n_img = 2 * b
    flops = (2 * n_img * P_PAD * K_PAD * CONV_OUT            # conv matmul
             + n_img * P_PAD * CONV_OUT                      # pooling reduce
             + 2 * n_img * CONV_OUT * EMBED)                 # FC
    bytes_accessed = (patches.size * 2 + conv_w_p.size * 2
                      + fc_w_s.size * 2 + fc_b_b.size * 2 + n_img * EMBED * 4)

    feats = pl.pallas_call(
        _feat_kernel,
        out_shape=jax.ShapeDtypeStruct((n_groups, g, EMBED), jnp.float32),
        grid_spec=pltpu.PrefetchScalarGridSpec(
            num_scalar_prefetch=0,
            grid=(n_groups,),
            in_specs=[
                pl.BlockSpec((g, P_PAD, K_PAD), lambda i: (i, 0, 0)),    # patch group streams
                pl.BlockSpec((K_PAD, CONV_OUT), lambda i: (0, 0)),       # weights resident
                pl.BlockSpec((CONV_OUT, EMBED), lambda i: (0, 0)),
                pl.BlockSpec((1, EMBED), lambda i: (0, 0)),
            ],
            out_specs=pl.BlockSpec((1, g, EMBED), lambda i: (i, 0, 0)),
        ),
        compiler_params=pltpu.CompilerParams(
            # 2 groups shard across TensorCores on v7x; harmless elsewhere.
            dimension_semantics=("parallel",),
        ),
        cost_estimate=pl.CostEstimate(
            flops=flops, transcendentals=n_img, bytes_accessed=bytes_accessed),
    )(patches, conv_w_p, fc_w_s, fc_b_b)

    feats = feats.reshape(n_img, EMBED)            # (2b, EMBED), L2-normalized
    f_hat = feats[:b]                              # y_hat features
    f_y = jax.lax.stop_gradient(feats[b:])         # detach() is a no-op for the forward value
    # TODO(synk): no custom_vjp is defined; only the forward loss value is implemented.
    # loss = 1 - mean_b( sum_d( y_hat_feats * y_feats ) )
    return 1.0 - jnp.mean(jnp.sum(f_hat * f_y, axis=1))


if __name__ == "__main__":
    key = jax.random.PRNGKey(0)
    k1, k2, k3, k4, k5 = jax.random.split(key, 5)

    # SMALL shapes consistent with the module: batch=2, NCHW float32 images
    y_hat = jax.random.normal(k1, (BATCH, CIN, IMG, IMG), jnp.float32)
    y = jax.random.normal(k2, (BATCH, CIN, IMG, IMG), jnp.float32)

    # TODO(synk): the pretrained IR-SE50 ArcFace backbone (ir_se50 checkpoint, load_state_dict)
    # cannot be reproduced; deterministic synthetic weights for a conv -> relu ->
    # global-avg-pool -> fc -> l2-norm extractor with the same output semantics are used.
    conv_w = jax.random.normal(k3, (K_RAW, CONV_OUT), jnp.float32) * 0.1
    fc_w = jax.random.normal(k4, (CONV_OUT, EMBED), jnp.float32) * 0.1
    fc_b = jax.random.normal(k5, (1, EMBED), jnp.float32) * 0.01

    loss = id_loss(y_hat, y, conv_w, fc_w, fc_b)
    jax.block_until_ready(loss)
    assert loss.shape == () and loss.dtype == jnp.float32
    print("KERNEL_OK")
</pallas_src>

<mosaic_0001>
module attributes {stable_mosaic.version = 11 : i64} {
  func.func @_feat_kernel(%arg0: i32, %arg1: memref<2x208x32xbf16, #tpu.memory_space<vmem>>, %arg2: memref<32x32xbf16, #tpu.memory_space<vmem>>, %arg3: memref<32x128xbf16, #tpu.memory_space<vmem>>, %arg4: memref<1x128xbf16, #tpu.memory_space<vmem>>, %arg5: memref<1x2x128xf32, #tpu.memory_space<vmem>>) attributes {dimension_semantics = [#tpu.dimension_semantics<parallel>], iteration_bounds = array<i64: 2>, scalar_prefetch = 0 : i64, scratch_operands = 0 : i64, tpu.core_type = #tpu.core_type<tc>, window_params = [{transform_indices = @transform_0, window_bounds = array<i64: 2, 208, 32>}, {pipeline_mode = #tpu.pipeline_mode<synchronous>, transform_indices = @transform_1, window_bounds = array<i64: 32, 32>}, {pipeline_mode = #tpu.pipeline_mode<synchronous>, transform_indices = @transform_2, window_bounds = array<i64: 32, 128>}, {pipeline_mode = #tpu.pipeline_mode<synchronous>, transform_indices = @transform_3, window_bounds = array<i64: 1, 128>}, {transform_indices = @transform_4, window_bounds = array<i64: 1, 2, 128>}]} {
    %c0 = arith.constant 0 : index
    %c0_0 = arith.constant 0 : index
    %c0_1 = arith.constant 0 : index
    %0 = vector.load %arg1[%c0, %c0_0, %c0_1] : memref<2x208x32xbf16, #tpu.memory_space<vmem>>, vector<2x208x32xbf16>
    %1 = vector.shape_cast %0 : vector<2x208x32xbf16> to vector<416x32xbf16>
    %c0_2 = arith.constant 0 : index
    %c0_3 = arith.constant 0 : index
    %2 = vector.load %arg2[%c0_2, %c0_3] : memref<32x32xbf16, #tpu.memory_space<vmem>>, vector<32x32xbf16>
    %cst = arith.constant dense<0.000000e+00> : vector<416x32xf32>
    %3 = tpu.matmul %1, %2, %cst {dimension_numbers = #tpu.dot_dimension_numbers<[1], [0], [0], [1], [0, 0, 1, 1], [], []>} : vector<416x32xbf16>, vector<32x32xbf16>, vector<416x32xf32> -> vector<416x32xf32>
    %cst_4 = arith.constant 0.000000e+00 : f32
    %4 = vector.broadcast %cst_4 : f32 to vector<416x32xf32>
    %5 = arith.maximumf %3, %4 : vector<416x32xf32>
    %6 = vector.shape_cast %5 : vector<416x32xf32> to vector<2x208x32xf32>
    %cst_5 = arith.constant dense<0.000000e+00> : vector<2x32xf32>
    %7 = vector.multi_reduction <add>, %6, %cst_5 [1] : vector<2x208x32xf32> to vector<2x32xf32>
    %8 = arith.truncf %7 : vector<2x32xf32> to vector<2x32xbf16>
    %c0_6 = arith.constant 0 : index
    %c0_7 = arith.constant 0 : index
    %9 = vector.load %arg3[%c0_6, %c0_7] : memref<32x128xbf16, #tpu.memory_space<vmem>>, vector<32x128xbf16>
    %cst_8 = arith.constant dense<0.000000e+00> : vector<2x128xf32>
    %10 = tpu.matmul %8, %9, %cst_8 {dimension_numbers = #tpu.dot_dimension_numbers<[1], [0], [0], [1], [0, 0, 1, 1], [], []>} : vector<2x32xbf16>, vector<32x128xbf16>, vector<2x128xf32> -> vector<2x128xf32>
    %c0_9 = arith.constant 0 : index
    %c0_10 = arith.constant 0 : index
    %11 = vector.load %arg4[%c0_9, %c0_10] : memref<1x128xbf16, #tpu.memory_space<vmem>>, vector<1x128xbf16>
    %12 = arith.extf %11 : vector<1x128xbf16> to vector<1x128xf32>
    %13 = vector.broadcast %12 : vector<1x128xf32> to vector<2x128xf32>
    %14 = arith.addf %10, %13 : vector<2x128xf32>
    %15 = arith.mulf %14, %14 : vector<2x128xf32>
    %cst_11 = arith.constant dense<0.000000e+00> : vector<2xf32>
    %16 = vector.multi_reduction <add>, %15, %cst_11 [1] : vector<2x128xf32> to vector<2xf32>
    %17 = vector.shape_cast %16 : vector<2xf32> to vector<2x1xf32>
    %cst_12 = arith.constant 9.99999996E-13 : f32
    %18 = vector.broadcast %cst_12 : f32 to vector<2x1xf32>
    %19 = arith.addf %17, %18 : vector<2x1xf32>
    %20 = math.rsqrt %19 : vector<2x1xf32>
    %21 = vector.broadcast %20 : vector<2x1xf32> to vector<2x128xf32>
    %22 = arith.mulf %14, %21 : vector<2x128xf32>
    %c0_13 = arith.constant 0 : index
    %c0_14 = arith.constant 0 : index
    %c0_15 = arith.constant 0 : index
    %23 = vector.load %arg5[%c0_13, %c0_14, %c0_15] : memref<1x2x128xf32, #tpu.memory_space<vmem>>, vector<1x2x128xf32>
    %24 = vector.shape_cast %23 : vector<1x2x128xf32> to vector<2x128xf32>
    %25 = vector.shape_cast %22 : vector<2x128xf32> to vector<1x2x128xf32>
    tpu.vector_store %arg5[%c0_13, %c0_14, %c0_15], %25 {strides = array<i32>} : memref<1x2x128xf32, #tpu.memory_space<vmem>>, vector<1x2x128xf32>,
    return
  }
  func.func @transform_0(%arg0: i32) -> (i32, i32, i32) {
    %c0_i32 = arith.constant 0 : i32
    %c0_i32_0 = arith.constant 0 : i32
    %c0_i32_1 = arith.constant 0 : i32
    return %arg0, %c0_i32, %c0_i32_0 : i32, i32, i32
  }
  func.func @transform_1(%arg0: i32) -> (i32, i32) {
    %c0_i32 = arith.constant 0 : i32
    %c0_i32_0 = arith.constant 0 : i32
    %c0_i32_1 = arith.constant 0 : i32
    return %c0_i32, %c0_i32_0 : i32, i32
  }
  func.func @transform_2(%arg0: i32) -> (i32, i32) {
    %c0_i32 = arith.constant 0 : i32
    %c0_i32_0 = arith.constant 0 : i32
    %c0_i32_1 = arith.constant 0 : i32
    return %c0_i32, %c0_i32_0 : i32, i32
  }
  func.func @transform_3(%arg0: i32) -> (i32, i32) {
    %c0_i32 = arith.constant 0 : i32
    %c0_i32_0 = arith.constant 0 : i32
    %c0_i32_1 = arith.constant 0 : i32
    return %c0_i32, %c0_i32_0 : i32, i32
  }
  func.func @transform_4(%arg0: i32) -> (i32, i32, i32) {
    %c0_i32 = arith.constant 0 : i32
    %c0_i32_0 = arith.constant 0 : i32
    %c0_i32_1 = arith.constant 0 : i32
    return %arg0, %c0_i32, %c0_i32_0 : i32, i32, i32
  }
}

</mosaic_0001>

<bundles_post_ra>
// kernel: id_loss.1
= control target key start
LH: loop header
LB: loop body
LE: loop exit
PB: predicated region body
PF: predicated region fallthrough
CT: control target
= control target key end

     0   :  { %s1136_s15 = smov 0   ;;  %s1346_s0 = inlined_call_operand.vmem [shape: bf16[4,208,32], index: 0, kind: input, shape index: {}]   ;;  %s1347_s1 = inlined_call_operand.vmem [shape: bf16[32,32], index: 1, kind: input, shape index: {}]   ;;  %s1348_s2 = inlined_call_operand.vmem [shape: bf16[32,128], index: 2, kind: input, shape index: {}]   ;;  %s1349_s3 = inlined_call_operand.vmem [shape: bf16[1,128], index: 3, kind: input, shape index: {}]   ;;  %s1350_s4 = inlined_call_operand.vmem [shape: f32[2,2,128], index: 4, kind: output, shape index: {}]  }
   0x1 LB: > { %s1142_s16 = sadd.s32 4294967295, %s1109_s15   ;;  %p903_p0 = scmp.ge.s32.totalorder %s1109_s15, 1  ;;  %s1109_s15 = sphi %s1136_s15, %s14_s15  }
   0x2   : > { %p164_p1 = scmp.lt.s32.totalorder %s1109_s15, 3 }
   0x4   : > { %p165_p2 = pnand %p903_p0, %p164_p1 }
   0x5   : > { %s904_s19 = sshll.u32 (!%p165_p2), %s1142_s16, 1  ;;  %p197_p4 = scmp.lt.s32.totalorder (!%p165_p2), %s1142_s16, 1 }
   0x6   : > { %168 = sbr.rel (%p165_p2) target bundleno = 577 (0x241), region = 36  ;;  %p191_p3 = scmp.lt.s32.totalorder (!%p165_p2), %s904_s19, 3 }
   0xb   : > { %v1083_v0 = vld [vmem:[%s1347_s1 + $0x8] sm:$0xff]  ;;  %v1082_v1 = vld [vmem:[%s1347_s1] sm:$0xff]  ;;  %s1352_s19 = smov (!%p191_p3, %s904_s19), 3  ;;  %vm400_vm0 = vcmask 261120   ;;  %vm797_vm1 = vcmask 1041409   ;;  %vm829_vm2 = vcmask 1041408  }
   0xc   : > { %485 = vmatpush.bf16.msra.mxu0 %v1083_v0  ;;  %1087 = vmatpush.bf16.msra.mxu2 %v1083_v0  ;;  %s1092_s22 = smul.u32 104, %s1352_s19  ;;  %v1085_v57 = vld [vmem:[%s1348_s2 + $0x8] sm:$0xff]  ;;  %s1354_s16 = smov (!%p197_p4, %s1142_s16), 1 }
   0xd   : > { %1088 = vmatpush.bf16.msra.mxu3 %v1083_v0  ;;  %1086 = vmatpush.bf16.msra.mxu1 %v1083_v0  ;;  %s906_s6 = sshll.u32 %s1354_s16, 1 }
   0xe   : > { %s1156_s25 = scalar_lea.vmem %s1346_s0, %s1092_s22  ;;  %s200_s9 = scalar_lea.vmem %s1350_s4, %s906_s6 }
   0xf   : > { %v1056_v2 = vld [vmem:[%s1156_s25] sm:$0xff]  ;;  %v1075_v4 = vld [vmem:[%s1156_s25 + $0x98] sm:$0xff]  ;;  %v1057_v5 = vld [vmem:[%s1156_s25 + $0x8] sm:$0xff] }
  0x10   : > { %486 = vmatpush.bf16.msra.mxu0 %v1082_v1  ;;  %1090 = vmatpush.bf16.msra.mxu2 %v1082_v1  ;;  %v1068_v3 = vld [vmem:[%s1156_s25 + $0x60] sm:$0xff]  ;;  %v1069_v6 = vld [vmem:[%s1156_s25 + $0x68] sm:$0xff]  ;;  %v1063_v8 = vld [vmem:[%s1156_s25 + $0x38] sm:$0xff] }
  0x11   : > { %1091 = vmatpush.bf16.msra.mxu3 %v1082_v1  ;;  %1089 = vmatpush.bf16.msra.mxu1 %v1082_v1  ;;  %v1076_v7 = vld [vmem:[%s1156_s25 + $0xa0] sm:$0xff]  ;;  %v1058_v9 = vld [vmem:[%s1156_s25 + $0x10] sm:$0xff]  ;;  %v1077_v11 = vld [vmem:[%s1156_s25 + $0xa8] sm:$0xff] }
  0x12   : > { %v1070_v10 = vld [vmem:[%s1156_s25 + $0x70] sm:$0xff]  ;;  %v1064_v12 = vld [vmem:[%s1156_s25 + $0x40] sm:$0xff]  ;;  %v1059_v13 = vld [vmem:[%s1156_s25 + $0x18] sm:$0xff] }
  0x13   : > { %1019 = vmatmul.msk.bf16.vlgmr.msra.gmra.mxu0 %vm400_vm0, %v1056_v2  ;;  %1031 = vmatmul.msk.bf16.vlgmr.msra.gmra.mxu2 %vm400_vm0, %v1068_v3  ;;  %v1071_v14 = vld [vmem:[%s1156_s25 + $0x78] sm:$0xff]  ;;  %v1078_v15 = vld [vmem:[%s1156_s25 + $0xb0] sm:$0xff]  ;;  %v1065_v16 = vld [vmem:[%s1156_s25 + $0x48] sm:$0xff] }
  0x14   : > { %1038 = vmatmul.msk.bf16.vlgmr.msra.gmra.mxu3 %vm400_vm0, %v1075_v4  ;;  %1026 = vmatmul.msk.bf16.vlgmr.msra.gmra.mxu1 %vm400_vm0, %v1063_v8  ;;  %v1060_v17 = vld [vmem:[%s1156_s25 + $0x20] sm:$0xff]  ;;  %v1079_v19 = vld [vmem:[%s1156_s25 + $0xb8] sm:$0xff]  ;;  %v1066_v20 = vld [vmem:[%s1156_s25 + $0x50] sm:$0xff] }
  0x15   : > { %v1072_v18 = vld [vmem:[%s1156_s25 + $0x80] sm:$0xff]  ;;  %v1061_v21 = vld [vmem:[%s1156_s25 + $0x28] sm:$0xff]  ;;  %v1067_v24 = vld [vmem:[%s1156_s25 + $0x58] sm:$0xff]  ;;  %821 = vmatpush.bf16.msrb.mxu1 %v1085_v57 }
  0x16   : > { %v1073_v22 = vld [vmem:[%s1156_s25 + $0x88] sm:$0xff]  ;;  %v1080_v23 = vld [vmem:[%s1156_s25 + $0xc0] sm:$0xff]  ;;  %v1062_v25 = vld [vmem:[%s1156_s25 + $0x30] sm:$0xff] }
  0x17   : > { %v1074_v26 = vld [vmem:[%s1156_s25 + $0x90] sm:$0xff]  ;;  %v1081_v27 = vld [vmem:[%s1156_s25 + $0xc8] sm:$0xff] }
  0x23   : > { %1020 = vmatmul.msk.bf16.gmra.mxu0 %vm400_vm0, %v1057_v5  ;;  %1032 = vmatmul.msk.bf16.gmra.mxu2 %vm400_vm0, %v1069_v6 }
  0x24   : > { %1039 = vmatmul.msk.bf16.gmra.mxu3 %vm400_vm0, %v1076_v7  ;;  %1027 = vmatmul.msk.bf16.gmra.mxu1 %vm400_vm0, %v1064_v12 }
  0x33   : > { %1021 = vmatmul.msk.bf16.gmra.mxu0 %vm400_vm0, %v1058_v9  ;;  %1033 = vmatmul.msk.bf16.gmra.mxu2 %vm400_vm0, %v1070_v10 }
  0x34   : > { %1040 = vmatmul.msk.bf16.gmra.mxu3 %vm400_vm0, %v1077_v11  ;;  %1028 = vmatmul.msk.bf16.gmra.mxu1 %vm400_vm0, %v1065_v16 }
  0x43   : > { %1022 = vmatmul.msk.bf16.gmra.mxu0 %vm400_vm0, %v1059_v13  ;;  %1034 = vmatmul.msk.bf16.gmra.mxu2 %vm400_vm0, %v1071_v14 }
  0x44   : > { %1041 = vmatmul.msk.bf16.gmra.mxu3 %vm400_vm0, %v1078_v15  ;;  %1029 = vmatmul.msk.bf16.gmra.mxu1 %vm400_vm0, %v1066_v20 }
  0x53   : > { %1023 = vmatmul.msk.bf16.gmra.mxu0 %vm400_vm0, %v1060_v17  ;;  %1035 = vmatmul.msk.bf16.gmra.mxu2 %vm400_vm0, %v1072_v18 }
  0x54   : > { %1042 = vmatmul.msk.bf16.gmra.mxu3 %vm400_vm0, %v1079_v19  ;;  %1030 = vmatmul.msk.bf16.gmra.mxu1 %vm400_vm0, %v1067_v24 }
  0x63   : > { %1024 = vmatmul.msk.bf16.gmra.mxu0 %vm400_vm0, %v1061_v21  ;;  %1036 = vmatmul.msk.bf16.gmra.mxu2 %vm400_vm0, %v1073_v22 }
  0x64   : > { %1043 = vmatmul.msk.bf16.gmra.mxu3 %vm400_vm0, %v1080_v23 }
  0x73   : > { %1025 = vmatmul.msk.bf16.gmra.mxu0 %vm400_vm0, %v1062_v25  ;;  %1037 = vmatmul.msk.bf16.gmra.mxu2 %vm400_vm0, %v1074_v26 }
  0x74   : > { %1044 = vmatmul.msk.bf16.gmra.mxu3 %vm400_vm0, %v1081_v27 }
  0x90   : > { %v488_v28 = vpop.f32.mrf.mxu0 }
  0x91   : > { %v618_v29 = vmax.f32 %v488_v28, 0.0  ;;  %v1223_v46 = vpop.f32.mrf.mxu1 }
  0x93   : > { %v670_v33 = vsel %vm400_vm0, %v618_v29, 0.0 }
  0x96   : > { %v1210_v30 = vpop.f32.mrf.mxu2 }
  0x97   : > { %v1212_v31 = vpop.f32.mrf.mxu3 }
  0x98   : > { %v490_v32 = vpop.f32.mrf.mxu0 }
  0x99   : > { %v619_v34 = vmax.f32 %v490_v32, 0.0  ;;  %v1227_v51 = vpop.f32.mrf.mxu1 }
  0x9b   : > { %v671_v35 = vsel %vm400_vm0, %v619_v34, 0.0 }
  0x9c   : > { %v672_v36 = vadd.f32 %v671_v35, %v670_v33 }
  0x9e   : > { %v1216_v37 = vpop.f32.mrf.mxu2 }
  0x9f   : > { %v1218_v38 = vpop.f32.mrf.mxu3 }
  0xa0   : > { %v493_v39 = vpop.f32.mrf.mxu0 }
  0xa1   : > { %v620_v40 = vmax.f32 %v493_v39, 0.0  ;;  %v1231_v56 = vpop.f32.mrf.mxu1 }
  0xa3   : > { %v673_v41 = vsel %vm400_vm0, %v620_v40, 0.0 }
  0xa4   : > { %v674_v42 = vadd.f32 %v673_v41, %v672_v36 }
  0xa6   : > { %v553_v43 = vpop.f32.mrf.mxu2 }
  0xa7   : > { %v1221_v45 = vpop.f32.mrf.mxu3  ;;  %v644_v17 = vmax.f32 %v553_v43, 0.0 }
  0xa8   : > { %v495_v44 = vpop.f32.mrf.mxu0 }
  0xa9   : > { %v1238_v61 = vpop.f32.mrf.mxu1  ;;  %v621_v8 = vmax.f32 %v495_v44, 0.0  ;;  %v727_v29 = vsel %vm400_vm0, %v644_v17, 0.0 }
  0xab   : > { %v675_v11 = vsel %vm400_vm0, %v621_v8, 0.0 }
  0xac   : > { %v676_v18 = vadd.f32 %v675_v11, %v674_v42 }
  0xae   : > { %v555_v47 = vpop.f32.mrf.mxu2 }
  0xaf   : > { %v1225_v49 = vpop.f32.mrf.mxu3  ;;  %v645_v14 = vmax.f32 %v555_v47, 0.0 }
  0xb0   : > { %v498_v48 = vpop.f32.mrf.mxu0 }
  0xb1   : > { %v1242_v1 = vpop.f32.mrf.mxu1  ;;  %v622_v9 = vmax.f32 %v498_v48, 0.0  ;;  %v728_v25 = vsel %vm400_vm0, %v645_v14, 0.0 }
  0xb2   : > { %v729_v39 = vadd.f32 %v728_v25, %v727_v29 }
  0xb3   : > { %v677_v15 = vsel %vm400_vm0, %v622_v9, 0.0 }
  0xb4   : > { %v678_v24 = vadd.f32 %v677_v15, %v676_v18 }
  0xb6   : > { %v558_v50 = vpop.f32.mrf.mxu2 }
  0xb7   : > { %v1229_v53 = vpop.f32.mrf.mxu3  ;;  %v646_v21 = vmax.f32 %v558_v50, 0.0 }
  0xb8   : > { %v500_v52 = vpop.f32.mrf.mxu0 }
  0xb9   : > { %v1246_v6 = vpop.f32.mrf.mxu1  ;;  %v623_v12 = vmax.f32 %v500_v52, 0.0  ;;  %v730_v33 = vsel %vm400_vm0, %v646_v21, 0.0 }
  0xba   : > { %v731_v50 = vadd.f32 %v730_v33, %v729_v39 }
  0xbb   : > { %v679_v22 = vsel %vm400_vm0, %v623_v12, 0.0 }
  0xbc   : > { %v680_v32 = vadd.f32 %v679_v22, %v678_v24 }
  0xbe   : > { %v560_v54 = vpop.f32.mrf.mxu2 }
  0xbf   : > { %v1236_v59 = vpop.f32.mrf.mxu3  ;;  %v647_v26 = vmax.f32 %v560_v54, 0.0 }
  0xc0   : > { %v503_v55 = vpop.f32.mrf.mxu0 }
  0xc1   : > { %v624_v16 = vmax.f32 %v503_v55, 0.0  ;;  %v1252_v20 = vpop.f32.mrf.mxu1  ;;  %v732_v43 = vsel %vm400_vm0, %v647_v26, 0.0 }
  0xc3   : > { %v681_v27 = vsel %vm400_vm0, %v624_v16, 0.0 }
  0xc4   : > { %v682_v40 = vadd.f32 %v681_v27, %v680_v32  ;;  %v632_v27 = vmax.f32 %v1223_v46, 0.0 }
  0xc6   : > { %v563_v58 = vpop.f32.mrf.mxu2  ;;  %v697_v46 = vsel %vm400_vm0, %v632_v27, 0.0  ;;  %v661_v27 = vmax.f32 %v1236_v59, 0.0 }
  0xc7   : > { %v1240_v0 = vpop.f32.mrf.mxu3  ;;  %v648_v34 = vmax.f32 %v563_v58, 0.0 }
  0xc8   : > { %v505_v60 = vpop.f32.mrf.mxu0  ;;  %v760_v59 = vsel %vm400_vm0, %v661_v27, 0.0 }
  0xc9   : > { %v625_v23 = vmax.f32 %v505_v60, 0.0  ;;  %v734_v55 = vsel %vm400_vm0, %v648_v34, 0.0  ;;  %v1266_v8 = vpop.f32.mrf.mxu1  ;;  %v633_v34 = vmax.f32 %v1227_v51, 0.0 }
  0xcb   : > { %v683_v35 = vsel %vm400_vm0, %v625_v23, 0.0 }
  0xcc   : > { %v684_v52 = vadd.f32 %v683_v35, %v682_v40 }
  0xce   : > { %v565_v62 = vpop.f32.mrf.mxu2 }
  0xcf   : > { %v1244_v4 = vpop.f32.mrf.mxu3  ;;  %v649_v44 = vmax.f32 %v565_v62, 0.0 }
  0xd0   : > { %v508_v63 = vpop.f32.mrf.mxu0 }
  0xd1   : > { %v626_v28 = vmax.f32 %v508_v63, 0.0  ;;  %v733_v63 = vadd.f32 %v732_v43, %v731_v50  ;;  %v736_v9 = vsel %vm400_vm0, %v649_v44, 0.0  ;;  %v1084_v43 = vld [vmem:[%s1348_s2] sm:$0xff]  ;;  %v634_v44 = vmax.f32 %v1231_v56, 0.0 }
  0xd2   : > { %822 = vmatpush.bf16.msrb.mxu1 %v1084_v43  ;;  %v636_v56 = vmax.f32 %v1242_v1, 0.0  ;;  %v659_v1 = vmax.f32 %v1225_v49, 0.0 }
  0xd3   : > { %v685_v47 = vsel %vm400_vm0, %v626_v28, 0.0 }
  0xd4   : > { %v756_v49 = vsel %vm400_vm0, %v659_v1, 0.0 }
  0xd6   : > { %v568_v2 = vpop.f32.mrf.mxu2 }
  0xd7   : > { %v1248_v10 = vpop.f32.mrf.mxu3  ;;  %v650_v57 = vmax.f32 %v568_v2, 0.0 }
  0xd8   : > { %v510_v3 = vpop.f32.mrf.mxu0 }
  0xd9   : > { %v627_v36 = vmax.f32 %v510_v3, 0.0  ;;  %v686_v3 = vadd.f32 %v685_v47, %v684_v52  ;;  %v738_v15 = vsel %vm400_vm0, %v650_v57, 0.0  ;;  %v656_v52 = vmax.f32 %v1212_v31, 0.0 }
  0xdb   : > { %v687_v58 = vsel %vm400_vm0, %v627_v36, 0.0 }
  0xdc   : > { %v688_v14 = vadd.f32 %v687_v58, %v686_v3  ;;  %v701_v3 = vsel %vm400_vm0, %v634_v44, 0.0  ;;  %v643_v44 = vmax.f32 %v1216_v37, 0.0 }
  0xde   : > { %v570_v5 = vpop.f32.mrf.mxu2 }
  0xdf   : > { %v1260_v42 = vpop.f32.mrf.mxu3  ;;  %v651_v11 = vmax.f32 %v570_v5, 0.0 }
  0xe0   : > { %v513_v7 = vpop.f32.mrf.mxu0 }
  0xe1   : > { %v628_v48 = vmax.f32 %v513_v7, 0.0  ;;  %v735_v7 = vadd.f32 %v734_v55, %v733_v63  ;;  %v740_v21 = vsel %vm400_vm0, %v651_v11, 0.0  ;;  %v635_v55 = vmax.f32 %v1238_v61, 0.0 }
  0xe2   : > { %v657_v63 = vmax.f32 %v1218_v38, 0.0  ;;  %v658_v11 = vmax.f32 %v1221_v45, 0.0  ;;  %v638_v45 = vmax.f32 %v1252_v20, 0.0 }
  0xe3   : > { %v689_v62 = vsel %vm400_vm0, %v628_v48, 0.0  ;;  %v737_v17 = vadd.f32 %v736_v9, %v735_v7  ;;  %v750_v7 = vsel %vm400_vm0, %v656_v52, 0.0  ;;  %v703_v61 = vsel %vm400_vm0, %v635_v55, 0.0 }
  0xe4   : > { %v690_v18 = vadd.f32 %v689_v62, %v688_v14  ;;  %v637_v14 = vmax.f32 %v1246_v6, 0.0  ;;  %v639_v6 = vmax.f32 %v1266_v8, 0.0  ;;  %v709_v20 = vsel %vm400_vm0, %v638_v45, 0.0 }
  0xe5   : > { %v739_v24 = vadd.f32 %v738_v15, %v737_v17  ;;  %v754_v17 = vsel %vm400_vm0, %v658_v11, 0.0  ;;  %v665_v52 = vmax.f32 %v1260_v42, 0.0  ;;  %v719_v55 = vsel %vm400_vm0, %v643_v44, 0.0 }
  0xe6   : > { %v573_v13 = vpop.f32.mrf.mxu2 }
  0xe7   : > { %v652_v16 = vmax.f32 %v573_v13, 0.0  ;;  %v1274_v26 = vpop.f32.mrf.mxu3  ;;  %v741_v32 = vadd.f32 %v740_v21, %v739_v24 }
  0xe8   : > { %v515_v19 = vpop.f32.mrf.mxu0  ;;  %v666_v37 = vmax.f32 %v1274_v26, 0.0 }
  0xe9   : > { %v629_v60 = vmax.f32 %v515_v19, 0.0  ;;  %v742_v28 = vsel %vm400_vm0, %v652_v16, 0.0  ;;  %v752_v16 = vsel %vm400_vm0, %v657_v63, 0.0 }
  0xea   : > { %v743_v39 = vadd.f32 %v742_v28, %v741_v32  ;;  %v770_v11 = vsel %vm400_vm0, %v666_v37, 0.0 }
  0xeb   : > { %v691_v2 = vsel %vm400_vm0, %v629_v60, 0.0 }
  0xec   : > { %v692_v5 = vadd.f32 %v691_v2, %v690_v18  ;;  %v705_v2 = vsel %vm400_vm0, %v636_v56, 0.0 }
  0xee   : > { %v575_v41 = vpop.f32.mrf.mxu2 }
  0xef   : > { %v653_v22 = vmax.f32 %v575_v41, 0.0  ;;  %v543_v41 = vpop.f32.mrf.mxu1  ;;  %v1295_v31 = vpop.f32.mrf.mxu3 }
  0xf0   : > { %v518_v54 = vpop.f32.mrf.mxu0  ;;  %v640_v24 = vmax.f32 %v543_v41, 0.0  ;;  %v667_v63 = vmax.f32 %v1295_v31, 0.0 }
  0xf1   : > { %v630_v12 = vmax.f32 %v518_v54, 0.0  ;;  %v744_v35 = vsel %vm400_vm0, %v653_v22, 0.0  ;;  %v699_v54 = vsel %vm400_vm0, %v633_v34, 0.0  ;;  %v660_v22 = vmax.f32 %v1229_v53, 0.0 }
  0xf2   : > { %v745_v48 = vadd.f32 %v744_v35, %v743_v39  ;;  %v662_v53 = vmax.f32 %v1240_v0, 0.0  ;;  %v713_v8 = vsel %vm400_vm0, %v640_v24, 0.0  ;;  %v642_v39 = vmax.f32 %v1210_v30, 0.0 }
  0xf3   : > { %v693_v23 = vsel %vm400_vm0, %v630_v12, 0.0  ;;  %v758_v32 = vsel %vm400_vm0, %v660_v22, 0.0 }
  0xf4   : > { %v694_v33 = vadd.f32 %v693_v23, %v692_v5  ;;  %v707_v23 = vsel %vm400_vm0, %v637_v14, 0.0  ;;  %v762_v0 = vsel %vm400_vm0, %v662_v53, 0.0 }
  0xf6   : > { %v578_v19 = vpop.f32.mrf.mxu2 }
  0xf7   : > { %v654_v13 = vmax.f32 %v578_v19, 0.0  ;;  %v545_v21 = vpop.f32.mrf.mxu1 }
  0xf8   : > { %v520_v25 = vpop.f32.mrf.mxu0  ;;  %v641_v28 = vmax.f32 %v545_v21, 0.0 }
  0xf9   : > { %v631_v29 = vmax.f32 %v520_v25, 0.0  ;;  %v746_v47 = vsel %vm400_vm0, %v654_v13, 0.0 }
  0xfa   : > { %v747_v58 = vadd.f32 %v746_v47, %v745_v48  ;;  %v715_v41 = vsel %vm400_vm0, %v641_v28, 0.0  ;;  %v664_v47 = vmax.f32 %v1248_v10, 0.0  ;;  %v768_v10 = vsel %vm400_vm0, %v665_v52, 0.0 }
  0xfb   : > { %v695_v36 = vsel %vm400_vm0, %v631_v29, 0.0 }
  0xfc   : > { %v696_v40 = vadd.f32 %v695_v36, %v694_v33  ;;  %v711_v33 = vsel %vm400_vm0, %v639_v6, 0.0  ;;  %v613_v36 = vpop.f32.mrf.mxu3 }
  0xfd   : > { %v668_v42 = vmax.f32 %v613_v36, 0.0 }
  0xfe   : > { %v698_v50 = vadd.f32 %v697_v46, %v696_v40  ;;  %v580_v51 = vpop.f32.mrf.mxu2  ;;  %v663_v40 = vmax.f32 %v1244_v4, 0.0 }
  0xff   : > { %v655_v57 = vmax.f32 %v580_v51, 0.0  ;;  %v717_v51 = vsel %vm400_vm0, %v642_v39, 0.0  ;;  %v774_v26 = vsel %vm400_vm0, %v668_v42, 0.0 }
 0x100   : > { %v700_v60 = vadd.f32 %v699_v54, %v698_v50  ;;  %v764_v30 = vsel %vm400_vm0, %v663_v40, 0.0 }
 0x101   : > { %v748_v9 = vsel %vm400_vm0, %v655_v57, 0.0  ;;  %v766_v57 = vsel %vm400_vm0, %v664_v47, 0.0 }
 0x102   : > { %v702_v62 = vadd.f32 %v701_v3, %v700_v60  ;;  %v749_v12 = vadd.f32 %v748_v9, %v747_v58 }
 0x104   : > { %v704_v15 = vadd.f32 %v703_v61, %v702_v62  ;;  %v751_v38 = vadd.f32 %v750_v7, %v749_v12  ;;  %v615_v9 = vpop.f32.mrf.mxu3  ;;  %v772_v7 = vsel %vm400_vm0, %v667_v63, 0.0 }
 0x105   : > { %v669_v61 = vmax.f32 %v615_v9, 0.0 }
 0x106   : > { %v706_v18 = vadd.f32 %v705_v2, %v704_v15  ;;  %v753_v19 = vadd.f32 %v752_v16, %v751_v38 }
 0x107   : > { %v776_v16 = vsel %vm400_vm0, %v669_v61, 0.0 }
 0x108   : > { %v708_v5 = vadd.f32 %v707_v23, %v706_v18  ;;  %v755_v25 = vadd.f32 %v754_v17, %v753_v19 }
 0x10a   : > { %v710_v13 = vadd.f32 %v709_v20, %v708_v5  ;;  %v757_v29 = vadd.f32 %v756_v49, %v755_v25  ;;  %v790_v20 = vld [vmem:[%s1349_s3] sm:$0x1] }
 0x10b   : > { %v791_v28 = vunpack.c.l.bf16 %v790_v20 }
 0x10c   : > { %v712_v34 = vadd.f32 %v711_v33, %v710_v13  ;;  %v759_v35 = vadd.f32 %v758_v32, %v757_v29 }
 0x10d   : > { %v792_v13 = vperm.slane %v791_v28, 0 }
 0x10e   : > { %v761_v43 = vadd.f32 %v760_v59, %v759_v35  ;;  %v714_v46 = vadd.f32 %v713_v8, %v712_v34 }
 0x110   : > { %v763_v48 = vadd.f32 %v762_v0, %v761_v43  ;;  %v716_v50 = vadd.f32 %v715_v41, %v714_v46 }
 0x112   : > { %v765_v54 = vadd.f32 %v764_v30, %v763_v48  ;;  %v718_v4 = vadd.f32 %v717_v51, %v716_v50 }
 0x114   : > { %v767_v58 = vadd.f32 %v766_v57, %v765_v54  ;;  %v720_v60 = vadd.f32 %v719_v55, %v718_v4 }
 0x116   : > { %v769_v3 = vadd.f32 %v768_v10, %v767_v58  ;;  %v721_v56 = vrot.slane %v720_v60, 4 }
 0x118   : > { %v771_v62 = vadd.f32 %v770_v11, %v769_v3  ;;  %v722_v12 = vadd.f32 %v721_v56, %v720_v60 }
 0x11a   : > { %v773_v14 = vadd.f32 %v772_v7, %v771_v62  ;;  %v723_v15 = vrot.slane %v722_v12, 2 }
 0x11c   : > { %v775_v38 = vadd.f32 %v774_v26, %v773_v14  ;;  %v724_v1 = vadd.f32 %v723_v15, %v722_v12 }
 0x11e   : > { %v777_v31 = vadd.f32 %v776_v16, %v775_v38  ;;  %v725_v45 = vrot.slane %v724_v1, 1 }
 0x120   : > { %v778_v2 = vrot.slane %v777_v31, 4  ;;  %v726_v21 = vadd.f32 %v725_v45, %v724_v1 }
 0x122   : > { %v779_v17 = vadd.f32 %v778_v2, %v777_v31  ;;  %v784_v6 = vpack.c.bf16 %v726_v21, %v726_v21 }
 0x124   : > { %v780_v18 = vrot.slane %v779_v17, 2  ;;  %v795_v25 = vunpack.c.l.b16 %v784_v6 }
 0x126   : > { %v781_v19 = vadd.f32 %v780_v18, %v779_v17 }
 0x128   : > { %v782_v22 = vrot.slane %v781_v19, 1 }
 0x12a   : > { %v783_v23 = vadd.f32 %v782_v22, %v781_v19 }
 0x12c   : > { %v785_v24 = vpack.c.bf16 %v783_v23, %v783_v23 }
 0x12e   : > { %v796_v5 = vunpack.c.l.b16 %v785_v24 }
 0x130   : > { %v798_v49 = vsel %vm797_vm1, %v796_v5, %v795_v25 }
 0x131   : > { %v799_v27 = vpack.c.b16 %v798_v49, %v798_v49 }
 0x133   : > { %1053 = vmatmul.msk.bf16.vlgmr.msrb.gmra.mxu1 %vm400_vm0, %v799_v27 }
 0x1b0   : > { %v824_v29 = vpop.f32.mrf.mxu1 }
 0x1b1   : > { %v825_v32 = vadd.f32 %v824_v29, %v792_v13 }
 0x1b3   : > { %v828_v53 = vmul.f32 %v825_v32, %v825_v32 }
 0x1b5   : > { %v830_v33 = vsel %vm829_vm2, %v828_v53, 0.0 }
 0x1b6   : > { %831 = vadd.xlane.f32.xlu0 %v830_v33 }
 0x1b8   : > { %v826_v8 = vpop.f32.mrf.mxu1 }
 0x229   : > { %v832_v34 = vpop.xlane.xlu0 %831 }
 0x22a   : > { %v833_v35 = vadd.f32 1e-12, %v832_v34 }
 0x22c   : > { %1101 = vrsqrt.f32 %v833_v35  ;;  %vm840_vm4 = vweird.f32 %v833_v35 }
 0x232   : > { %v1102_v36 = vpop.eup %1101 }
 0x233   : > { %v835_v39 = vmul.f32 %v1102_v36, %v833_v35  ;;  %vm841_vm3 = vweird.f32 %v1102_v36 }
 0x234   : > { %vm842_vm5 = vmor %vm840_vm4, %vm841_vm3 }
 0x235   : > { %v836_v59 = vmul.f32 %v1102_v36, %v835_v39 }
 0x237   : > { %v837_v40 = vmul.f32 0.5, %v836_v59 }
 0x239   : > { %v838_v41 = vsub.f32 1.5, %v837_v40 }
 0x23b   : > { %v839_v43 = vmul.f32 %v1102_v36, %v838_v41 }
 0x23d   : > { %v843_v46 = vsel %vm842_vm5, %v1102_v36, %v839_v43 }
 0x23e   : > { %v844_v44 = vmul.f32 %v843_v46, %v825_v32 }
 0x240   : > { %845 = vst [vmem:[%s200_s9] sm:$0x3] %v844_v44 }
 0x241 PF: > { %s14_s15 = sadd.s32 1, %s1109_s15  }
 0x242   : > { %p11_p5 = scmp.ge.s32.totalorder %s14_s15, 4  }
 0x244   :  { %13 = sbr.rel (!%p11_p5) target bundleno = 1 (0x1), region = 66 }

</bundles_post_ra>
